<compile_context>
chip_gen: v7x
topology: tpu7x:2x2x1
jax: 0.10.0
libtpu: 0.0.40
codegen_flags: <defaults>
</compile_context>

<pallas_src>
import jax
import jax.numpy as jnp
from jax.experimental import pallas as pl
from jax.experimental.pallas import tpu as pltpu

EPS = 1e-10

_TARGET_BLOCK_BYTES = 4 * 1024 * 1024   # ~4 MiB input block: mem-bound sweet spot
_SMALL_INPUT_BYTES = 1 * 1024 * 1024    # below this, one un-gridded block is fine


def _vmem_budget_and_limit():
    """Generation-aware VMEM sizing: (block budget bytes, vmem_limit_bytes)."""
    cap = None
    try:
        cap = getattr(pltpu.get_tpu_info(), "vmem_capacity_bytes", None)
    except Exception:
        cap = None
    if cap is not None and cap >= 128 * 1024 * 1024:
        # v5e / v6e: 128 MiB physical VMEM -> be generous.
        return 48 * 1024 * 1024, 64 * 1024 * 1024
    # v7x (64 MiB physical, 32 MiB scoped default) or unknown: conservative.
    return 24 * 1024 * 1024, 32 * 1024 * 1024


def _l1norm_kernel(x_ref, o_ref):
    # x_ref / o_ref: (TB, D) block resident in VMEM.
    x = x_ref[...]
    # Accumulate in f32 so bf16 / low-precision inputs keep precision over the
    # D-term reduction (free for f32 inputs).
    xf = x.astype(jnp.float32)
    # Row-wise L1 norm: lane-axis reduction goes to the XLU.  It is free on
    # v5e/v6e (HBM-bound); revisit with the MXU-ones trick only if a v7x
    # bundle dump shows the 2 XLU slots saturating.
    norm = jnp.sum(jnp.abs(xf), axis=1, keepdims=True) + EPS
    # Exact divide: matches the PyTorch reference; hidden under HBM time.
    o_ref[...] = (xf / norm).astype(o_ref.dtype)


def _choose_tb(B, D, itemsize, vmem_budget):
    """Largest row tile (multiple of 8 sublanes) that (a) keeps the
    double-buffered in+out blocks plus f32 temporaries within the VMEM budget,
    (b) targets ~4 MiB input blocks, and (c) leaves >=2 grid blocks for
    non-tiny batches so both v7x TensorCores get work."""
    row_bytes = D * itemsize
    f32_row_bytes = D * 4
    # Per row: 2 arrays (in, out) x 2 pipeline buffers of native width,
    # plus ~2 f32-wide in-kernel temporaries (|x| / the product before cast).
    per_row = 4 * row_bytes + 2 * f32_row_bytes
    tb = min(vmem_budget // per_row, max(1, _TARGET_BLOCK_BYTES // row_bytes))
    if B * row_bytes > _SMALL_INPUT_BYTES:
        half = ((pl.cdiv(B, 2) + 7) // 8) * 8
        tb = min(tb, half)
    return max(8, (tb // 8) * 8)


def l1norm(x: jax.Array, *, tb: int | None = None) -> jax.Array:
    """L1-normalize each row of a (B, D) array (HardNet L1Norm semantics)."""
    B, D = x.shape
    itemsize = jnp.dtype(x.dtype).itemsize
    row_bytes = D * itemsize
    vmem_budget, vmem_limit = _vmem_budget_and_limit()
    if tb is None:
        tb = _choose_tb(B, D, itemsize, vmem_budget)

    # Genuinely tiny workloads: single un-gridded block covering the whole
    # array -- skips per-step pipeline overhead entirely.
    if B <= tb and B * row_bytes <= _SMALL_INPUT_BYTES:
        return pl.pallas_call(
            _l1norm_kernel,
            out_shape=jax.ShapeDtypeStruct((B, D), x.dtype),
            compiler_params=pltpu.CompilerParams(vmem_limit_bytes=vmem_limit),
        )(x)

    # Gridded path on the unpadded array.  Rows are independent, so the
    # ragged last block is safe: Pallas pads the read and masks out-of-bounds
    # writes; garbage rows in the pad region never touch valid output.
    # NOTE: do not add any cross-row reduction here without re-adding masking.
    n_blocks = pl.cdiv(B, tb)
    return pl.pallas_call(
        _l1norm_kernel,
        out_shape=jax.ShapeDtypeStruct((B, D), x.dtype),
        grid_spec=pltpu.PrefetchScalarGridSpec(
            num_scalar_prefetch=0,
            grid=(n_blocks,),
            in_specs=[pl.BlockSpec((tb, D), lambda i: (i, 0))],
            out_specs=pl.BlockSpec((tb, D), lambda i: (i, 0)),
        ),
        compiler_params=pltpu.CompilerParams(
            # Batch axis is embarrassingly parallel -> lets v7x's two
            # TensorCores split the grid.
            dimension_semantics=("parallel",),
            vmem_limit_bytes=vmem_limit,
        ),
    )(x)


def _ref_l1norm(x):
    return x / (jnp.sum(jnp.abs(x), axis=1, keepdims=True) + EPS)


if __name__ == "__main__":
    key = jax.random.PRNGKey(0)
    k1, k2 = jax.random.split(key)

    # Small descriptor batch (HardNet descriptor size D=128): exercises the
    # single-block, no-grid fast path.
    x_small = jax.random.normal(k1, (16, 128), dtype=jnp.float32)
    out_small = jax.block_until_ready(l1norm(x_small))
    ref_small = _ref_l1norm(x_small)
    assert out_small.shape == x_small.shape and out_small.dtype == x_small.dtype
    assert jnp.allclose(out_small, ref_small, atol=1e-6, rtol=1e-4)

    # Ragged gridded path: B not a multiple of the tile, no pad / slice in the
    # wrapper (last block is partially masked by Pallas).
    x_rag = jax.random.normal(k2, (200, 128), dtype=jnp.float32)
    out_rag = jax.block_until_ready(l1norm(x_rag, tb=64))
    ref_rag = _ref_l1norm(x_rag)
    assert out_rag.shape == x_rag.shape and out_rag.dtype == x_rag.dtype
    assert jnp.allclose(out_rag, ref_rag, atol=1e-6, rtol=1e-4)

    print("KERNEL_OK")
</pallas_src>

<mosaic_0001>
module attributes {stable_mosaic.version = 11 : i64} {
  func.func @_l1norm_kernel(%arg0: memref<16x128xf32, #tpu.memory_space<vmem>>, %arg1: memref<16x128xf32, #tpu.memory_space<vmem>>) attributes {dimension_semantics = [], scalar_prefetch = 0 : i64, scratch_operands = 0 : i64, tpu.core_type = #tpu.core_type<tc>} {
    %c0 = arith.constant 0 : index
    %c0_0 = arith.constant 0 : index
    %0 = vector.load %arg0[%c0, %c0_0] : memref<16x128xf32, #tpu.memory_space<vmem>>, vector<16x128xf32>
    %1 = math.absf %0 : vector<16x128xf32>
    %cst = arith.constant dense<0.000000e+00> : vector<16xf32>
    %2 = vector.multi_reduction <add>, %1, %cst [1] : vector<16x128xf32> to vector<16xf32>
    %3 = vector.shape_cast %2 : vector<16xf32> to vector<16x1xf32>
    %cst_1 = arith.constant 1.000000e-10 : f32
    %4 = vector.broadcast %cst_1 : f32 to vector<16x1xf32>
    %5 = arith.addf %3, %4 : vector<16x1xf32>
    %6 = vector.broadcast %5 : vector<16x1xf32> to vector<16x128xf32>
    %7 = arith.divf %0, %6 : vector<16x128xf32>
    %c0_2 = arith.constant 0 : index
    %c0_3 = arith.constant 0 : index
    %8 = vector.load %arg1[%c0_2, %c0_3] : memref<16x128xf32, #tpu.memory_space<vmem>>, vector<16x128xf32>
    tpu.vector_store %arg1[%c0_2, %c0_3], %7 {strides = array<i32>} : memref<16x128xf32, #tpu.memory_space<vmem>>, vector<16x128xf32>,
    return
  }
}

</mosaic_0001>

<bundles_post_ra>
// kernel: tpu_custom_call.1
= control target key start
LH: loop header
LB: loop body
LE: loop exit
PB: predicated region body
PF: predicated region fallthrough
CT: control target
= control target key end

     0   :  { %6 = vsyncpa [#allocation3], 0  ;;  %s156_s0 = inlined_call_operand.hbm [shape: f32[16,128], index: 0, kind: input, shape index: {}]   ;;  %s157_s1 = inlined_call_operand.hbm [shape: f32[16,128], index: 1, kind: output, shape index: {}]  }
   0x1   :  { %7 = vsyncpa [#allocation4], 0  ;;  %s112_s6 = smov [#allocation2]   ;;  %s64_s10 = scalar_lea.hbm %s156_s0, 256 }
   0x2   :  { %s13_s7 = sshll.u32 %s112_s6, 4  ;;  %p65_p0 = scmp.ne.s32.totalorder %s156_s0, %s64_s10  ;;  %s14_s7 = int_to_ptr.vmem [resolvable:$true] %s13_s7 }
   0x3   :  { %p68_p1 = scmp.lt.u32.totalorder %s64_s10, %s156_s0 }
   0x5   :  { %p70_p2 = pnand %p68_p1, %p65_p0 }
   0x7   :  { %73 = shalt.err (!%p70_p2)
}
   0x8   :  { %s74_s15 = scalar_lea.vmem %s14_s7, 256  ;;  %p79_p4 = scmp.lt.s32.totalorder %s14_s7, %s14_s7 }
   0x9   :  { %p75_p3 = scmp.ne.s32.totalorder %s14_s7, %s74_s15  ;;  %p80_p5 = scmp.lt.s32.totalorder %s74_s15, %s74_s15 }
   0xb   :  { %p81_p6 = por %p80_p5, %p79_p4 }
   0xd   :  { %p82_p7 = pnand %p81_p6, %p75_p3 }
   0xf   :  { %85 = shalt.err (!%p82_p7)
}
  0x10   :  { %s113_s16 = smov 128   ;;  %s114_s17 = smov 8  }
  0x11   :  { %19 = dma.hbm_to_vmem [thread:$0]  %s156_s0, 256, %s14_s7, [#allocation3], %s113_s16, %s113_s16, %s114_s17  }
  0x12   :  { %108 = dma.done.wait [#allocation3], 256  }
  0x13   :  { %109 = vsyncadd [#allocation3], 4294967040  ;;  %v23_v0 = vld [vmem:[#allocation2] sm:$0xff]  ;;  %v24_v1 = vld [vmem:[#allocation2 + $0x8] sm:$0xff]  ;;  %s115_s20 = smov [#allocation5]  }
  0x14   :  { %v25_v2 = vand.u32 2147483647, %v23_v0  ;;  %v26_v3 = vand.u32 2147483647, %v24_v1  ;;  %s44_s21 = sshll.u32 %s115_s20, 4  ;;  %s45_s21 = int_to_ptr.vmem [resolvable:$true] %s44_s21 }
  0x15   :  { %s86_s0 = scalar_lea.vmem %s45_s21, 256  ;;  %p91_p9 = scmp.lt.s32.totalorder %s45_s21, %s45_s21 }
  0x16   :  { %27 = vadd.xlane.f32.xlu0 %v25_v2  ;;  %p87_p8 = scmp.ne.s32.totalorder %s45_s21, %s86_s0  ;;  %p92_p10 = scmp.lt.s32.totalorder %s86_s0, %s86_s0 }
  0x18   :  { %p93_p11 = por %p92_p10, %p91_p9 }
  0x1a   :  { %29 = vadd.xlane.f32.xlu0 %v26_v3  ;;  %p94_p12 = pnand %p93_p11, %p87_p8 }
  0xa3   :  { %v28_v4 = vpop.xlane.xlu0 %27 }
  0xa4   :  { %v31_v5 = vadd.f32 1e-10, %v28_v4 }
  0xa6   :  { %60 = vrcp.f32 %v31_v5 }
  0xa7   :  { %v30_v6 = vpop.xlane.xlu0 %29 }
  0xa8   :  { %v32_v7 = vadd.f32 1e-10, %v30_v6 }
  0xaa   :  { %62 = vrcp.f32 %v32_v7 }
  0xb0   :  { %v61_v8 = vpop.eup %60 }
  0xb1   :  { %v34_v9 = vmul.f32 %v61_v8, %v23_v0 }
  0xb3   :  { %37 = vst [vmem:[#allocation5] sm:$0xff] %v34_v9 }
  0xb4   :  { %v63_v10 = vpop.eup %62 }
  0xb5   :  { %v36_v11 = vmul.f32 %v63_v10, %v24_v1 }
  0xb7   :  { %38 = vst [vmem:[#allocation5 + $0x8] sm:$0xff] %v36_v11 }
  0xb8   :  { %97 = shalt.err (!%p94_p12)
}
  0xb9   :  { %s98_s24 = scalar_lea.hbm %s157_s1, 256 }
  0xba   :  { %p99_p13 = scmp.ne.s32.totalorder %s157_s1, %s98_s24  ;;  %p102_p0 = scmp.lt.u32.totalorder %s98_s24, %s157_s1 }
  0xbc   :  { %p104_p1 = pnand %p102_p0, %p99_p13 }
  0xbe   :  { %107 = shalt.err (!%p104_p1)
}
  0xbf   :  { %50 = dma.vmem_to_hbm [thread:$0]  %s45_s21, 256, %s157_s1, [#allocation4], %s113_s16, %s113_s16, %s114_s17  }
  0xc0   :  { %110 = dma.done.wait [#allocation4], 256  }
  0xc1   :  { %111 = vsyncadd [#allocation4], 4294967040 }
  0xc2   :  { %54 = vsyncpa [#allocation3], 1 }
  0xc3   :  { %55 = vsyncpa [#allocation4], 1 }

</bundles_post_ra>
